<compile_context>
chip_gen: v6e
topology: v6e:2x2x1
jax: 0.10.0
libtpu: 0.0.40
codegen_flags: <defaults>
</compile_context>

<pallas_src>
import functools

import jax
import jax.numpy as jnp
import numpy as np
from jax.experimental import pallas as pl
from jax.experimental.pallas import tpu as pltpu  # noqa: F401  (kept for TPU-specific tuning)

_LN_EPS = 1e-5               # torch.nn.LayerNorm default
_APPROX_RECIPROCAL = False   # True -> EUP approx reciprocal (loosen test tolerance accordingly)


def _layer_norm(y, gamma, beta, eps):
    mu = jnp.mean(y, axis=-1, keepdims=True)
    c = y - mu
    var = jnp.mean(c * c, axis=-1, keepdims=True)
    return c * jax.lax.rsqrt(var + eps) * gamma + beta


# ---------------------------------------------------------------------------
# Kernel 1: fused MultiHeadAttention -> (+residual) -> LayerNorm
# ---------------------------------------------------------------------------
def _attn_ln_kernel(qk_ref, v_ref, wqkv_ref, bqkv_ref, wo_ref, bo_ref,
                    g_ref, beta_ref, o_ref,
                    *, B, S, kd, vd, shared_qkv, eps):
    x_qk = qk_ref[...]                      # (B*S, D)  query == key input
    w = wqkv_ref[...]                       # (D, 2*kd + vd) packed [wq | wk | wv]
    b = bqkv_ref[...]                       # (1, 2*kd + vd)

    if shared_qkv:
        # self-attention: query == key == value input -> one fused projection matmul
        qkv = jnp.dot(x_qk, w, preferred_element_type=jnp.float32) + b
        q, k, v = qkv[:, :kd], qkv[:, kd:2 * kd], qkv[:, 2 * kd:]
        x_res = x_qk
    else:
        # cross-attention: query == key input differs from the value (== residual) input
        x_v = v_ref[...]
        qk = jnp.dot(x_qk, w[:, :2 * kd], preferred_element_type=jnp.float32) + b[:, :2 * kd]
        v = jnp.dot(x_v, w[:, 2 * kd:], preferred_element_type=jnp.float32) + b[:, 2 * kd:]
        q, k = qk[:, :kd], qk[:, kd:]
        x_res = x_v

    qb = q.reshape(B, S, kd)
    kb = k.reshape(B, S, kd)
    vb = v.reshape(B, S, vd)

    # scores: contraction over last dims (no explicit k.T), fp32 accumulation on the MXU
    s = jnp.einsum("bqd,bkd->bqk", qb, kb, preferred_element_type=jnp.float32)
    s = s * (1.0 / float(kd) ** 0.5)
    m = jnp.max(s, axis=-1, keepdims=True)
    e = jnp.exp(s - m)
    p = e * pl.reciprocal(jnp.sum(e, axis=-1, keepdims=True), approx=_APPROX_RECIPROCAL)
    attn = jnp.einsum("bqk,bkd->bqd", p, vb, preferred_element_type=jnp.float32)

    # identical heads: concat([attn]*H) @ Wl == attn @ sum_h Wl[h]  (Wl folded wrapper-side)
    mha = jnp.dot(attn.reshape(B * S, vd), wo_ref[...],
                  preferred_element_type=jnp.float32) + bo_ref[...]

    # residual (== value input) + LayerNorm
    # TODO(synk): nn.Dropout(p=0.2) treated as identity (eval mode); torch RNG not reproduced.
    o_ref[...] = _layer_norm(x_res + mha, g_ref[...], beta_ref[...], eps).astype(o_ref.dtype)


# ---------------------------------------------------------------------------
# Kernel 2: fused FeedForward -> (+residual) -> LayerNorm
# ---------------------------------------------------------------------------
def _ff_ln_kernel(x_ref, w1_ref, b1_ref, w2_ref, b2_ref, g_ref, beta_ref, o_ref, *, eps):
    x = x_ref[...]
    h = jnp.dot(x, w1_ref[...], preferred_element_type=jnp.float32) + b1_ref[...]
    h = jnp.maximum(h, 0.0)
    ff = jnp.dot(h, w2_ref[...], preferred_element_type=jnp.float32) + b2_ref[...]
    o_ref[...] = _layer_norm(x + ff, g_ref[...], beta_ref[...], eps).astype(o_ref.dtype)


# ---------------------------------------------------------------------------
# Kernel 3: final Linear projection
# ---------------------------------------------------------------------------
def _linear_kernel(x_ref, w_ref, b_ref, o_ref):
    o_ref[...] = (jnp.dot(x_ref[...], w_ref[...], preferred_element_type=jnp.float32)
                  + b_ref[...]).astype(o_ref.dtype)


# ---------------------------------------------------------------------------
# Wrappers (single kernel invocation each; whole arrays live in VMEM — grid collapsed)
# ---------------------------------------------------------------------------
def _call_attn_block(qk_in, v_in, packed_mha, ln, *, B, S, shared_qkv):
    w_qkv, b_qkv, w_o, b_o = packed_mha
    gamma, beta = ln
    D = qk_in.shape[-1]
    vd = w_o.shape[0]
    kd = (w_qkv.shape[1] - vd) // 2
    kernel = functools.partial(_attn_ln_kernel, B=B, S=S, kd=kd, vd=vd,
                               shared_qkv=shared_qkv, eps=_LN_EPS)
    return pl.pallas_call(
        kernel,
        out_shape=jax.ShapeDtypeStruct((B * S, D), qk_in.dtype),
    )(qk_in, v_in, w_qkv, b_qkv, w_o, b_o, gamma, beta)


def _call_ff_block(x, ff, ln):
    w1, b1, w2, b2 = ff
    gamma, beta = ln
    kernel = functools.partial(_ff_ln_kernel, eps=_LN_EPS)
    return pl.pallas_call(
        kernel,
        out_shape=jax.ShapeDtypeStruct(x.shape, x.dtype),
    )(x, w1, b1, w2, b2, gamma, beta)


def _call_linear(x, w, b):
    return pl.pallas_call(
        _linear_kernel,
        out_shape=jax.ShapeDtypeStruct((x.shape[0], w.shape[1]), x.dtype),
    )(x, w, b)


# ---------------------------------------------------------------------------
# Positional encoding (constant input prep, same formula as the torch code; plain jnp)
# ---------------------------------------------------------------------------
def positioning_encoding(seq_length, model_dim):
    pos = jnp.arange(seq_length, dtype=jnp.float32).reshape(1, -1, 1)
    dim = jnp.arange(model_dim, dtype=jnp.float32).reshape(1, 1, -1)
    phase = (pos / 10000.0) ** (dim // float(model_dim))
    return jnp.where(dim.astype(jnp.int32) % 2 == 0, -jnp.sin(phase), jnp.cos(phase))


# ---------------------------------------------------------------------------
# Parameters (torch nn.Linear layout stored transposed as (in, out)) + kernel-side packing
# ---------------------------------------------------------------------------
def _init_linear(key, in_dim, out_dim):
    kw, kb = jax.random.split(key)
    bound = 1.0 / np.sqrt(in_dim)
    w = jax.random.uniform(kw, (in_dim, out_dim), jnp.float32, -bound, bound)
    b = jax.random.uniform(kb, (1, out_dim), jnp.float32, -bound, bound)
    return w, b


def _init_mha(key, model_dim, num_heads):
    kd = vd = model_dim // num_heads
    k1, k2, k3, k4 = jax.random.split(key, 4)
    wq, bq = _init_linear(k1, model_dim, kd)
    wk, bk = _init_linear(k2, model_dim, kd)
    wv, bv = _init_linear(k3, model_dim, vd)
    wl, bl = _init_linear(k4, num_heads * vd, model_dim)
    return dict(wq=wq, bq=bq, wk=wk, bk=bk, wv=wv, bv=bv, wl=wl, bl=bl)


def _init_ln(key, dim):
    kg, kb = jax.random.split(key)
    gamma = 1.0 + 0.1 * jax.random.normal(kg, (1, dim), jnp.float32)
    beta = 0.1 * jax.random.normal(kb, (1, dim), jnp.float32)
    return gamma, beta


def _init_ff(key, model_dim, forward_dim):
    k1, k2 = jax.random.split(key)
    w1, b1 = _init_linear(k1, model_dim, forward_dim)
    w2, b2 = _init_linear(k2, forward_dim, model_dim)
    return (w1, b1, w2, b2)


def init_transformer_params(key, model_dim, output_dim, num_heads, forward_dim):
    ks = jax.random.split(key, 11)
    return dict(
        enc_attn=_init_mha(ks[0], model_dim, num_heads), enc_attn_ln=_init_ln(ks[1], model_dim),
        enc_ff=_init_ff(ks[2], model_dim, forward_dim), enc_ff_ln=_init_ln(ks[3], model_dim),
        dec_attn1=_init_mha(ks[4], model_dim, num_heads), dec_attn1_ln=_init_ln(ks[5], model_dim),
        dec_attn2=_init_mha(ks[6], model_dim, num_heads), dec_attn2_ln=_init_ln(ks[7], model_dim),
        dec_ff=_init_ff(ks[8], model_dim, forward_dim), dec_ff_ln=_init_ln(ks[9], model_dim),
        out=_init_linear(ks[10], model_dim, output_dim),
    )


def _pack_mha(mha, num_heads):
    # Fuse Q/K/V projections into one (D, 2*kd+vd) weight and fold the identical-head concat
    # into the output projection:  concat([h]*H) @ Wl == h @ Wl.reshape(H, vd, D).sum(0)
    w_qkv = jnp.concatenate([mha["wq"], mha["wk"], mha["wv"]], axis=1)
    b_qkv = jnp.concatenate([mha["bq"], mha["bk"], mha["bv"]], axis=1)
    vd = mha["wv"].shape[1]
    D = mha["wl"].shape[1]
    w_o = mha["wl"].reshape(num_heads, vd, D).sum(axis=0)
    return (w_qkv, b_qkv, w_o, mha["bl"])


def pack_transformer_params(params, num_heads):
    return dict(
        enc_attn=_pack_mha(params["enc_attn"], num_heads), enc_attn_ln=params["enc_attn_ln"],
        enc_ff=params["enc_ff"], enc_ff_ln=params["enc_ff_ln"],
        dec_attn1=_pack_mha(params["dec_attn1"], num_heads), dec_attn1_ln=params["dec_attn1_ln"],
        dec_attn2=_pack_mha(params["dec_attn2"], num_heads), dec_attn2_ln=params["dec_attn2_ln"],
        dec_ff=params["dec_ff"], dec_ff_ln=params["dec_ff_ln"],
        out=params["out"],
    )


# ---------------------------------------------------------------------------
# Full model forward (Pallas kernel path). Activations flow as a flat (B*S, D) matrix.
# ---------------------------------------------------------------------------
def transformer_forward(X, Y, packed, *, n_layers_enc, n_layers_dec):
    B, S, D = X.shape
    pe = positioning_encoding(S, D)

    # ---- Encoder ----
    x = (X + pe).reshape(B * S, D)
    for _ in range(n_layers_enc):
        a = _call_attn_block(x, x, packed["enc_attn"], packed["enc_attn_ln"],
                             B=B, S=S, shared_qkv=True)
        x = _call_ff_block(a, packed["enc_ff"], packed["enc_ff_ln"])
    enc = x

    # ---- Decoder ----
    y = (Y + pe).reshape(B * S, D)
    for _ in range(n_layers_dec):
        y = _call_attn_block(y, y, packed["dec_attn1"], packed["dec_attn1_ln"],
                             B=B, S=S, shared_qkv=True)
        y = _call_attn_block(enc, y, packed["dec_attn2"], packed["dec_attn2_ln"],
                             B=B, S=S, shared_qkv=False)
        y = _call_ff_block(y, packed["dec_ff"], packed["dec_ff_ln"])

    w_out, b_out = packed["out"]
    out = _call_linear(y, w_out, b_out)
    return out.reshape(B, S, -1)


# ---------------------------------------------------------------------------
# Pure-JAX reference mirroring the PyTorch module structure (unfused weights)
# ---------------------------------------------------------------------------
def _ref_mha(q_in, k_in, v_in, mha, num_heads):
    q = q_in @ mha["wq"] + mha["bq"]
    k = k_in @ mha["wk"] + mha["bk"]
    v = v_in @ mha["wv"] + mha["bv"]
    scale = q.shape[-1] ** 0.5
    att = jax.nn.softmax(jnp.einsum("bqd,bkd->bqk", q, k) / scale, axis=-1)
    head = jnp.einsum("bqk,bkd->bqd", att, v)
    concat = jnp.concatenate([head] * num_heads, axis=-1)
    return concat @ mha["wl"] + mha["bl"]


def _ref_ln(x, ln):
    gamma, beta = ln
    mu = x.mean(-1, keepdims=True)
    var = ((x - mu) ** 2).mean(-1, keepdims=True)
    return (x - mu) / jnp.sqrt(var + _LN_EPS) * gamma + beta


def _ref_ff(x, ff):
    w1, b1, w2, b2 = ff
    return jnp.maximum(x @ w1 + b1, 0.0) @ w2 + b2


def _reference_transformer(X, Y, params, *, n_layers_enc, n_layers_dec, num_heads):
    _, S, D = X.shape
    pe = positioning_encoding(S, D)
    x = X + pe
    for _ in range(n_layers_enc):
        a = _ref_ln(x + _ref_mha(x, x, x, params["enc_attn"], num_heads), params["enc_attn_ln"])
        x = _ref_ln(a + _ref_ff(a, params["enc_ff"]), params["enc_ff_ln"])
    enc = x
    y = Y + pe
    for _ in range(n_layers_dec):
        y = _ref_ln(y + _ref_mha(y, y, y, params["dec_attn1"], num_heads), params["dec_attn1_ln"])
        y = _ref_ln(y + _ref_mha(enc, enc, y, params["dec_attn2"], num_heads), params["dec_attn2_ln"])
        y = _ref_ln(y + _ref_ff(y, params["dec_ff"]), params["dec_ff_ln"])
    w_out, b_out = params["out"]
    return y @ w_out + b_out


if __name__ == "__main__":
    # Small shapes consistent with the module: TransformerModel(model_dim=32, output_dim=50)
    B, S, model_dim = 2, 8, 32
    num_heads = 4                # key_dim = value_dim = 8
    forward_dim = 64
    output_dim = 50
    n_layers_enc = n_layers_dec = 2

    root = jax.random.PRNGKey(0)
    kp, kx, ky = jax.random.split(root, 3)
    params = init_transformer_params(kp, model_dim, output_dim, num_heads, forward_dim)
    packed = pack_transformer_params(params, num_heads)

    X = jax.random.normal(kx, (B, S, model_dim), jnp.float32)
    Y = jax.random.normal(ky, (B, S, model_dim), jnp.float32)

    fwd = jax.jit(functools.partial(transformer_forward,
                                    n_layers_enc=n_layers_enc, n_layers_dec=n_layers_dec))
    out = jax.block_until_ready(fwd(X, Y, packed))

    ref = _reference_transformer(X, Y, params, n_layers_enc=n_layers_enc,
                                 n_layers_dec=n_layers_dec, num_heads=num_heads)
    np.testing.assert_allclose(np.asarray(out), np.asarray(ref), rtol=1e-4, atol=1e-4)

    print("KERNEL_OK")
</pallas_src>

<mosaic_0001>
module attributes {stable_mosaic.version = 11 : i64} {
  func.func @_attn_ln_kernel(%arg0: memref<16x32xf32, #tpu.memory_space<vmem>>, %arg1: memref<16x32xf32, #tpu.memory_space<vmem>>, %arg2: memref<32x24xf32, #tpu.memory_space<vmem>>, %arg3: memref<1x24xf32, #tpu.memory_space<vmem>>, %arg4: memref<8x32xf32, #tpu.memory_space<vmem>>, %arg5: memref<1x32xf32, #tpu.memory_space<vmem>>, %arg6: memref<1x32xf32, #tpu.memory_space<vmem>>, %arg7: memref<1x32xf32, #tpu.memory_space<vmem>>, %arg8: memref<16x32xf32, #tpu.memory_space<vmem>>) attributes {dimension_semantics = [], scalar_prefetch = 0 : i64, scratch_operands = 0 : i64, tpu.core_type = #tpu.core_type<tc>} {
    %c0 = arith.constant 0 : index
    %c0_0 = arith.constant 0 : index
    %0 = vector.load %arg0[%c0, %c0_0] : memref<16x32xf32, #tpu.memory_space<vmem>>, vector<16x32xf32>
    %c0_1 = arith.constant 0 : index
    %c0_2 = arith.constant 0 : index
    %1 = vector.load %arg2[%c0_1, %c0_2] : memref<32x24xf32, #tpu.memory_space<vmem>>, vector<32x24xf32>
    %c0_3 = arith.constant 0 : index
    %c0_4 = arith.constant 0 : index
    %2 = vector.load %arg3[%c0_3, %c0_4] : memref<1x24xf32, #tpu.memory_space<vmem>>, vector<1x24xf32>
    %cst = arith.constant dense<0.000000e+00> : vector<16x24xf32>
    %3 = tpu.matmul %0, %1, %cst {dimension_numbers = #tpu.dot_dimension_numbers<[1], [0], [0], [1], [0, 0, 1, 1], [], []>} : vector<16x32xf32>, vector<32x24xf32>, vector<16x24xf32> -> vector<16x24xf32>
    %4 = vector.broadcast %2 : vector<1x24xf32> to vector<16x24xf32>
    %5 = arith.addf %3, %4 : vector<16x24xf32>
    %6 = vector.extract_strided_slice %5 {offsets = [0, 0], sizes = [16, 8], strides = [1, 1]} : vector<16x24xf32> to vector<16x8xf32>
    %7 = vector.extract_strided_slice %5 {offsets = [0, 8], sizes = [16, 8], strides = [1, 1]} : vector<16x24xf32> to vector<16x8xf32>
    %8 = vector.extract_strided_slice %5 {offsets = [0, 16], sizes = [16, 8], strides = [1, 1]} : vector<16x24xf32> to vector<16x8xf32>
    %9 = vector.shape_cast %6 : vector<16x8xf32> to vector<2x8x8xf32>
    %10 = vector.shape_cast %7 : vector<16x8xf32> to vector<2x8x8xf32>
    %11 = vector.shape_cast %8 : vector<16x8xf32> to vector<2x8x8xf32>
    "tpu.trace_start"() <{level = 10 : i32, message = "bqd,bkd->bqk"}> : () -> ()
    %cst_5 = arith.constant dense<0.000000e+00> : vector<2x8x8xf32>
    %12 = tpu.matmul %9, %10, %cst_5 {dimension_numbers = #tpu.dot_dimension_numbers<[2], [2], [1], [1], [0, 0, 0, 1, 1, 1], [0], [0]>} : vector<2x8x8xf32>, vector<2x8x8xf32>, vector<2x8x8xf32> -> vector<2x8x8xf32>
    "tpu.trace_stop"() : () -> ()
    %cst_6 = arith.constant 0.353553385 : f32
    %13 = vector.broadcast %cst_6 : f32 to vector<2x8x8xf32>
    %14 = arith.mulf %12, %13 : vector<2x8x8xf32>
    %cst_7 = arith.constant dense<0xFF800000> : vector<2x8xf32>
    %15 = vector.multi_reduction <maximumf>, %14, %cst_7 [2] : vector<2x8x8xf32> to vector<2x8xf32>
    %16 = vector.shape_cast %15 : vector<2x8xf32> to vector<2x8x1xf32>
    %17 = vector.broadcast %16 : vector<2x8x1xf32> to vector<2x8x8xf32>
    %18 = arith.subf %14, %17 : vector<2x8x8xf32>
    %19 = math.exp %18 : vector<2x8x8xf32>
    %cst_8 = arith.constant dense<0.000000e+00> : vector<2x8xf32>
    %20 = vector.multi_reduction <add>, %19, %cst_8 [2] : vector<2x8x8xf32> to vector<2x8xf32>
    %21 = vector.shape_cast %20 : vector<2x8xf32> to vector<2x8x1xf32>
    %22 = tpu.reciprocal %21 : vector<2x8x1xf32> -> vector<2x8x1xf32>
    %23 = vector.broadcast %22 : vector<2x8x1xf32> to vector<2x8x8xf32>
    %24 = arith.mulf %19, %23 : vector<2x8x8xf32>
    "tpu.trace_start"() <{level = 10 : i32, message = "bqk,bkd->bqd"}> : () -> ()
    %cst_9 = arith.constant dense<0.000000e+00> : vector<2x8x8xf32>
    %25 = tpu.matmul %24, %11, %cst_9 {dimension_numbers = #tpu.dot_dimension_numbers<[2], [1], [1], [2], [0, 0, 0, 1, 1, 2], [0], [0]>} : vector<2x8x8xf32>, vector<2x8x8xf32>, vector<2x8x8xf32> -> vector<2x8x8xf32>
    "tpu.trace_stop"() : () -> ()
    %26 = vector.shape_cast %25 : vector<2x8x8xf32> to vector<16x8xf32>
    %c0_10 = arith.constant 0 : index
    %c0_11 = arith.constant 0 : index
    %27 = vector.load %arg4[%c0_10, %c0_11] : memref<8x32xf32, #tpu.memory_space<vmem>>, vector<8x32xf32>
    %cst_12 = arith.constant dense<0.000000e+00> : vector<16x32xf32>
    %28 = tpu.matmul %26, %27, %cst_12 {dimension_numbers = #tpu.dot_dimension_numbers<[1], [0], [0], [1], [0, 0, 1, 1], [], []>} : vector<16x8xf32>, vector<8x32xf32>, vector<16x32xf32> -> vector<16x32xf32>
    %c0_13 = arith.constant 0 : index
    %c0_14 = arith.constant 0 : index
    %29 = vector.load %arg5[%c0_13, %c0_14] : memref<1x32xf32, #tpu.memory_space<vmem>>, vector<1x32xf32>
    %30 = vector.broadcast %29 : vector<1x32xf32> to vector<16x32xf32>
    %31 = arith.addf %28, %30 : vector<16x32xf32>
    %32 = arith.addf %0, %31 : vector<16x32xf32>
    %c0_15 = arith.constant 0 : index
    %c0_16 = arith.constant 0 : index
    %33 = vector.load %arg6[%c0_15, %c0_16] : memref<1x32xf32, #tpu.memory_space<vmem>>, vector<1x32xf32>
    %c0_17 = arith.constant 0 : index
    %c0_18 = arith.constant 0 : index
    %34 = vector.load %arg7[%c0_17, %c0_18] : memref<1x32xf32, #tpu.memory_space<vmem>>, vector<1x32xf32>
    %cst_19 = arith.constant dense<0.000000e+00> : vector<16xf32>
    %35 = vector.multi_reduction <add>, %32, %cst_19 [1] : vector<16x32xf32> to vector<16xf32>
    %36 = vector.shape_cast %35 : vector<16xf32> to vector<16x1xf32>
    %cst_20 = arith.constant 3.200000e+01 : f32
    %37 = vector.broadcast %cst_20 : f32 to vector<16x1xf32>
    %38 = arith.divf %36, %37 : vector<16x1xf32>
    %39 = vector.broadcast %38 : vector<16x1xf32> to vector<16x32xf32>
    %40 = arith.subf %32, %39 : vector<16x32xf32>
    %41 = arith.mulf %40, %40 : vector<16x32xf32>
    %cst_21 = arith.constant dense<0.000000e+00> : vector<16xf32>
    %42 = vector.multi_reduction <add>, %41, %cst_21 [1] : vector<16x32xf32> to vector<16xf32>
    %43 = vector.shape_cast %42 : vector<16xf32> to vector<16x1xf32>
    %cst_22 = arith.constant 3.200000e+01 : f32
    %44 = vector.broadcast %cst_22 : f32 to vector<16x1xf32>
    %45 = arith.divf %43, %44 : vector<16x1xf32>
    %cst_23 = arith.constant 9.99999974E-6 : f32
    %46 = vector.broadcast %cst_23 : f32 to vector<16x1xf32>
    %47 = arith.addf %45, %46 : vector<16x1xf32>
    %48 = math.rsqrt %47 : vector<16x1xf32>
    %49 = vector.broadcast %48 : vector<16x1xf32> to vector<16x32xf32>
    %50 = arith.mulf %40, %49 : vector<16x32xf32>
    %51 = vector.broadcast %33 : vector<1x32xf32> to vector<16x32xf32>
    %52 = arith.mulf %50, %51 : vector<16x32xf32>
    %53 = vector.broadcast %34 : vector<1x32xf32> to vector<16x32xf32>
    %54 = arith.addf %52, %53 : vector<16x32xf32>
    %c0_24 = arith.constant 0 : index
    %c0_25 = arith.constant 0 : index
    %55 = vector.load %arg8[%c0_24, %c0_25] : memref<16x32xf32, #tpu.memory_space<vmem>>, vector<16x32xf32>
    tpu.vector_store %arg8[%c0_24, %c0_25], %54 {strides = array<i32>} : memref<16x32xf32, #tpu.memory_space<vmem>>, vector<16x32xf32>,
    return
  }
}

module attributes {stable_mosaic.version = 11 : i64} {
  func.func @_attn_ln_kernel(%arg0: memref<16x32xf32, #tpu.memory_space<vmem>>, %arg1: memref<16x32xf32, #tpu.memory_space<vmem>>, %arg2: memref<32x24xf32, #tpu.memory_space<vmem>>, %arg3: memref<1x24xf32, #tpu.memory_space<vmem>>, %arg4: memref<8x32xf32, #tpu.memory_space<vmem>>, %arg5: memref<1x32xf32, #tpu.memory_space<vmem>>, %arg6: memref<1x32xf32, #tpu.memory_space<vmem>>, %arg7: memref<1x32xf32, #tpu.memory_space<vmem>>, %arg8: memref<16x32xf32, #tpu.memory_space<vmem>>) attributes {dimension_semantics = [], scalar_prefetch = 0 : i64, scratch_operands = 0 : i64, tpu.core_type = #tpu.core_type<tc>} {
    %c0 = arith.constant 0 : index
    %c0_0 = arith.constant 0 : index
    %0 = vector.load %arg0[%c0, %c0_0] : memref<16x32xf32, #tpu.memory_space<vmem>>, vector<16x32xf32>
    %c0_1 = arith.constant 0 : index
    %c0_2 = arith.constant 0 : index
    %1 = vector.load %arg2[%c0_1, %c0_2] : memref<32x24xf32, #tpu.memory_space<vmem>>, vector<32x24xf32>
    %c0_3 = arith.constant 0 : index
    %c0_4 = arith.constant 0 : index
    %2 = vector.load %arg3[%c0_3, %c0_4] : memref<1x24xf32, #tpu.memory_space<vmem>>, vector<1x24xf32>
    %c0_5 = arith.constant 0 : index
    %c0_6 = arith.constant 0 : index
    %3 = vector.load %arg1[%c0_5, %c0_6] : memref<16x32xf32, #tpu.memory_space<vmem>>, vector<16x32xf32>
    %4 = vector.extract_strided_slice %1 {offsets = [0, 0], sizes = [32, 16], strides = [1, 1]} : vector<32x24xf32> to vector<32x16xf32>
    %cst = arith.constant dense<0.000000e+00> : vector<16x16xf32>
    %5 = tpu.matmul %0, %4, %cst {dimension_numbers = #tpu.dot_dimension_numbers<[1], [0], [0], [1], [0, 0, 1, 1], [], []>} : vector<16x32xf32>, vector<32x16xf32>, vector<16x16xf32> -> vector<16x16xf32>
    %6 = vector.extract_strided_slice %2 {offsets = [0, 0], sizes = [1, 16], strides = [1, 1]} : vector<1x24xf32> to vector<1x16xf32>
    %7 = vector.broadcast %6 : vector<1x16xf32> to vector<16x16xf32>
    %8 = arith.addf %5, %7 : vector<16x16xf32>
    %9 = vector.extract_strided_slice %1 {offsets = [0, 16], sizes = [32, 8], strides = [1, 1]} : vector<32x24xf32> to vector<32x8xf32>
    %cst_7 = arith.constant dense<0.000000e+00> : vector<16x8xf32>
    %10 = tpu.matmul %3, %9, %cst_7 {dimension_numbers = #tpu.dot_dimension_numbers<[1], [0], [0], [1], [0, 0, 1, 1], [], []>} : vector<16x32xf32>, vector<32x8xf32>, vector<16x8xf32> -> vector<16x8xf32>
    %11 = vector.extract_strided_slice %2 {offsets = [0, 16], sizes = [1, 8], strides = [1, 1]} : vector<1x24xf32> to vector<1x8xf32>
    %12 = vector.broadcast %11 : vector<1x8xf32> to vector<16x8xf32>
    %13 = arith.addf %10, %12 : vector<16x8xf32>
    %14 = vector.extract_strided_slice %8 {offsets = [0, 0], sizes = [16, 8], strides = [1, 1]} : vector<16x16xf32> to vector<16x8xf32>
    %15 = vector.extract_strided_slice %8 {offsets = [0, 8], sizes = [16, 8], strides = [1, 1]} : vector<16x16xf32> to vector<16x8xf32>
    %16 = vector.shape_cast %14 : vector<16x8xf32> to vector<2x8x8xf32>
    %17 = vector.shape_cast %15 : vector<16x8xf32> to vector<2x8x8xf32>
    %18 = vector.shape_cast %13 : vector<16x8xf32> to vector<2x8x8xf32>
    "tpu.trace_start"() <{level = 10 : i32, message = "bqd,bkd->bqk"}> : () -> ()
    %cst_8 = arith.constant dense<0.000000e+00> : vector<2x8x8xf32>
    %19 = tpu.matmul %16, %17, %cst_8 {dimension_numbers = #tpu.dot_dimension_numbers<[2], [2], [1], [1], [0, 0, 0, 1, 1, 1], [0], [0]>} : vector<2x8x8xf32>, vector<2x8x8xf32>, vector<2x8x8xf32> -> vector<2x8x8xf32>
    "tpu.trace_stop"() : () -> ()
    %cst_9 = arith.constant 0.353553385 : f32
    %20 = vector.broadcast %cst_9 : f32 to vector<2x8x8xf32>
    %21 = arith.mulf %19, %20 : vector<2x8x8xf32>
    %cst_10 = arith.constant dense<0xFF800000> : vector<2x8xf32>
    %22 = vector.multi_reduction <maximumf>, %21, %cst_10 [2] : vector<2x8x8xf32> to vector<2x8xf32>
    %23 = vector.shape_cast %22 : vector<2x8xf32> to vector<2x8x1xf32>
    %24 = vector.broadcast %23 : vector<2x8x1xf32> to vector<2x8x8xf32>
    %25 = arith.subf %21, %24 : vector<2x8x8xf32>
    %26 = math.exp %25 : vector<2x8x8xf32>
    %cst_11 = arith.constant dense<0.000000e+00> : vector<2x8xf32>
    %27 = vector.multi_reduction <add>, %26, %cst_11 [2] : vector<2x8x8xf32> to vector<2x8xf32>
    %28 = vector.shape_cast %27 : vector<2x8xf32> to vector<2x8x1xf32>
    %29 = tpu.reciprocal %28 : vector<2x8x1xf32> -> vector<2x8x1xf32>
    %30 = vector.broadcast %29 : vector<2x8x1xf32> to vector<2x8x8xf32>
    %31 = arith.mulf %26, %30 : vector<2x8x8xf32>
    "tpu.trace_start"() <{level = 10 : i32, message = "bqk,bkd->bqd"}> : () -> ()
    %cst_12 = arith.constant dense<0.000000e+00> : vector<2x8x8xf32>
    %32 = tpu.matmul %31, %18, %cst_12 {dimension_numbers = #tpu.dot_dimension_numbers<[2], [1], [1], [2], [0, 0, 0, 1, 1, 2], [0], [0]>} : vector<2x8x8xf32>, vector<2x8x8xf32>, vector<2x8x8xf32> -> vector<2x8x8xf32>
    "tpu.trace_stop"() : () -> ()
    %33 = vector.shape_cast %32 : vector<2x8x8xf32> to vector<16x8xf32>
    %c0_13 = arith.constant 0 : index
    %c0_14 = arith.constant 0 : index
    %34 = vector.load %arg4[%c0_13, %c0_14] : memref<8x32xf32, #tpu.memory_space<vmem>>, vector<8x32xf32>
    %cst_15 = arith.constant dense<0.000000e+00> : vector<16x32xf32>
    %35 = tpu.matmul %33, %34, %cst_15 {dimension_numbers = #tpu.dot_dimension_numbers<[1], [0], [0], [1], [0, 0, 1, 1], [], []>} : vector<16x8xf32>, vector<8x32xf32>, vector<16x32xf32> -> vector<16x32xf32>
    %c0_16 = arith.constant 0 : index
    %c0_17 = arith.constant 0 : index
    %36 = vector.load %arg5[%c0_16, %c0_17] : memref<1x32xf32, #tpu.memory_space<vmem>>, vector<1x32xf32>
    %37 = vector.broadcast %36 : vector<1x32xf32> to vector<16x32xf32>
    %38 = arith.addf %35, %37 : vector<16x32xf32>
    %39 = arith.addf %3, %38 : vector<16x32xf32>
    %c0_18 = arith.constant 0 : index
    %c0_19 = arith.constant 0 : index
    %40 = vector.load %arg6[%c0_18, %c0_19] : memref<1x32xf32, #tpu.memory_space<vmem>>, vector<1x32xf32>
    %c0_20 = arith.constant 0 : index
    %c0_21 = arith.constant 0 : index
    %41 = vector.load %arg7[%c0_20, %c0_21] : memref<1x32xf32, #tpu.memory_space<vmem>>, vector<1x32xf32>
    %cst_22 = arith.constant dense<0.000000e+00> : vector<16xf32>
    %42 = vector.multi_reduction <add>, %39, %cst_22 [1] : vector<16x32xf32> to vector<16xf32>
    %43 = vector.shape_cast %42 : vector<16xf32> to vector<16x1xf32>
    %cst_23 = arith.constant 3.200000e+01 : f32
    %44 = vector.broadcast %cst_23 : f32 to vector<16x1xf32>
    %45 = arith.divf %43, %44 : vector<16x1xf32>
    %46 = vector.broadcast %45 : vector<16x1xf32> to vector<16x32xf32>
    %47 = arith.subf %39, %46 : vector<16x32xf32>
    %48 = arith.mulf %47, %47 : vector<16x32xf32>
    %cst_24 = arith.constant dense<0.000000e+00> : vector<16xf32>
    %49 = vector.multi_reduction <add>, %48, %cst_24 [1] : vector<16x32xf32> to vector<16xf32>
    %50 = vector.shape_cast %49 : vector<16xf32> to vector<16x1xf32>
    %cst_25 = arith.constant 3.200000e+01 : f32
    %51 = vector.broadcast %cst_25 : f32 to vector<16x1xf32>
    %52 = arith.divf %50, %51 : vector<16x1xf32>
    %cst_26 = arith.constant 9.99999974E-6 : f32
    %53 = vector.broadcast %cst_26 : f32 to vector<16x1xf32>
    %54 = arith.addf %52, %53 : vector<16x1xf32>
    %55 = math.rsqrt %54 : vector<16x1xf32>
    %56 = vector.broadcast %55 : vector<16x1xf32> to vector<16x32xf32>
    %57 = arith.mulf %47, %56 : vector<16x32xf32>
    %58 = vector.broadcast %40 : vector<1x32xf32> to vector<16x32xf32>
    %59 = arith.mulf %57, %58 : vector<16x32xf32>
    %60 = vector.broadcast %41 : vector<1x32xf32> to vector<16x32xf32>
    %61 = arith.addf %59, %60 : vector<16x32xf32>
    %c0_27 = arith.constant 0 : index
    %c0_28 = arith.constant 0 : index
    %62 = vector.load %arg8[%c0_27, %c0_28] : memref<16x32xf32, #tpu.memory_space<vmem>>, vector<16x32xf32>
    tpu.vector_store %arg8[%c0_27, %c0_28], %61 {strides = array<i32>} : memref<16x32xf32, #tpu.memory_space<vmem>>, vector<16x32xf32>,
    return
  }
}

module attributes {stable_mosaic.version = 11 : i64} {
  func.func @_ff_ln_kernel(%arg0: memref<16x32xf32, #tpu.memory_space<vmem>>, %arg1: memref<32x64xf32, #tpu.memory_space<vmem>>, %arg2: memref<1x64xf32, #tpu.memory_space<vmem>>, %arg3: memref<64x32xf32, #tpu.memory_space<vmem>>, %arg4: memref<1x32xf32, #tpu.memory_space<vmem>>, %arg5: memref<1x32xf32, #tpu.memory_space<vmem>>, %arg6: memref<1x32xf32, #tpu.memory_space<vmem>>, %arg7: memref<16x32xf32, #tpu.memory_space<vmem>>) attributes {dimension_semantics = [], scalar_prefetch = 0 : i64, scratch_operands = 0 : i64, tpu.core_type = #tpu.core_type<tc>} {
    %c0 = arith.constant 0 : index
    %c0_0 = arith.constant 0 : index
    %0 = vector.load %arg0[%c0, %c0_0] : memref<16x32xf32, #tpu.memory_space<vmem>>, vector<16x32xf32>
    %c0_1 = arith.constant 0 : index
    %c0_2 = arith.constant 0 : index
    %1 = vector.load %arg1[%c0_1, %c0_2] : memref<32x64xf32, #tpu.memory_space<vmem>>, vector<32x64xf32>
    %cst = arith.constant dense<0.000000e+00> : vector<16x64xf32>
    %2 = tpu.matmul %0, %1, %cst {dimension_numbers = #tpu.dot_dimension_numbers<[1], [0], [0], [1], [0, 0, 1, 1], [], []>} : vector<16x32xf32>, vector<32x64xf32>, vector<16x64xf32> -> vector<16x64xf32>
    %c0_3 = arith.constant 0 : index
    %c0_4 = arith.constant 0 : index
    %3 = vector.load %arg2[%c0_3, %c0_4] : memref<1x64xf32, #tpu.memory_space<vmem>>, vector<1x64xf32>
    %4 = vector.broadcast %3 : vector<1x64xf32> to vector<16x64xf32>
    %5 = arith.addf %2, %4 : vector<16x64xf32>
    %cst_5 = arith.constant 0.000000e+00 : f32
    %6 = vector.broadcast %cst_5 : f32 to vector<16x64xf32>
    %7 = arith.maximumf %5, %6 : vector<16x64xf32>
    %c0_6 = arith.constant 0 : index
    %c0_7 = arith.constant 0 : index
    %8 = vector.load %arg3[%c0_6, %c0_7] : memref<64x32xf32, #tpu.memory_space<vmem>>, vector<64x32xf32>
    %cst_8 = arith.constant dense<0.000000e+00> : vector<16x32xf32>
    %9 = tpu.matmul %7, %8, %cst_8 {dimension_numbers = #tpu.dot_dimension_numbers<[1], [0], [0], [1], [0, 0, 1, 1], [], []>} : vector<16x64xf32>, vector<64x32xf32>, vector<16x32xf32> -> vector<16x32xf32>
    %c0_9 = arith.constant 0 : index
    %c0_10 = arith.constant 0 : index
    %10 = vector.load %arg4[%c0_9, %c0_10] : memref<1x32xf32, #tpu.memory_space<vmem>>, vector<1x32xf32>
    %11 = vector.broadcast %10 : vector<1x32xf32> to vector<16x32xf32>
    %12 = arith.addf %9, %11 : vector<16x32xf32>
    %13 = arith.addf %0, %12 : vector<16x32xf32>
    %c0_11 = arith.constant 0 : index
    %c0_12 = arith.constant 0 : index
    %14 = vector.load %arg5[%c0_11, %c0_12] : memref<1x32xf32, #tpu.memory_space<vmem>>, vector<1x32xf32>
    %c0_13 = arith.constant 0 : index
    %c0_14 = arith.constant 0 : index
    %15 = vector.load %arg6[%c0_13, %c0_14] : memref<1x32xf32, #tpu.memory_space<vmem>>, vector<1x32xf32>
    %cst_15 = arith.constant dense<0.000000e+00> : vector<16xf32>
    %16 = vector.multi_reduction <add>, %13, %cst_15 [1] : vector<16x32xf32> to vector<16xf32>
    %17 = vector.shape_cast %16 : vector<16xf32> to vector<16x1xf32>
    %cst_16 = arith.constant 3.200000e+01 : f32
    %18 = vector.broadcast %cst_16 : f32 to vector<16x1xf32>
    %19 = arith.divf %17, %18 : vector<16x1xf32>
    %20 = vector.broadcast %19 : vector<16x1xf32> to vector<16x32xf32>
    %21 = arith.subf %13, %20 : vector<16x32xf32>
    %22 = arith.mulf %21, %21 : vector<16x32xf32>
    %cst_17 = arith.constant dense<0.000000e+00> : vector<16xf32>
    %23 = vector.multi_reduction <add>, %22, %cst_17 [1] : vector<16x32xf32> to vector<16xf32>
    %24 = vector.shape_cast %23 : vector<16xf32> to vector<16x1xf32>
    %cst_18 = arith.constant 3.200000e+01 : f32
    %25 = vector.broadcast %cst_18 : f32 to vector<16x1xf32>
    %26 = arith.divf %24, %25 : vector<16x1xf32>
    %cst_19 = arith.constant 9.99999974E-6 : f32
    %27 = vector.broadcast %cst_19 : f32 to vector<16x1xf32>
    %28 = arith.addf %26, %27 : vector<16x1xf32>
    %29 = math.rsqrt %28 : vector<16x1xf32>
    %30 = vector.broadcast %29 : vector<16x1xf32> to vector<16x32xf32>
    %31 = arith.mulf %21, %30 : vector<16x32xf32>
    %32 = vector.broadcast %14 : vector<1x32xf32> to vector<16x32xf32>
    %33 = arith.mulf %31, %32 : vector<16x32xf32>
    %34 = vector.broadcast %15 : vector<1x32xf32> to vector<16x32xf32>
    %35 = arith.addf %33, %34 : vector<16x32xf32>
    %c0_20 = arith.constant 0 : index
    %c0_21 = arith.constant 0 : index
    %36 = vector.load %arg7[%c0_20, %c0_21] : memref<16x32xf32, #tpu.memory_space<vmem>>, vector<16x32xf32>
    tpu.vector_store %arg7[%c0_20, %c0_21], %35 {strides = array<i32>} : memref<16x32xf32, #tpu.memory_space<vmem>>, vector<16x32xf32>,
    return
  }
}

module attributes {stable_mosaic.version = 11 : i64} {
  func.func @_linear_kernel(%arg0: memref<16x32xf32, #tpu.memory_space<vmem>>, %arg1: memref<32x50xf32, #tpu.memory_space<vmem>>, %arg2: memref<1x50xf32, #tpu.memory_space<vmem>>, %arg3: memref<16x50xf32, #tpu.memory_space<vmem>>) attributes {dimension_semantics = [], scalar_prefetch = 0 : i64, scratch_operands = 0 : i64, tpu.core_type = #tpu.core_type<tc>} {
    %c0 = arith.constant 0 : index
    %c0_0 = arith.constant 0 : index
    %0 = vector.load %arg0[%c0, %c0_0] : memref<16x32xf32, #tpu.memory_space<vmem>>, vector<16x32xf32>
    %c0_1 = arith.constant 0 : index
    %c0_2 = arith.constant 0 : index
    %1 = vector.load %arg1[%c0_1, %c0_2] : memref<32x50xf32, #tpu.memory_space<vmem>>, vector<32x50xf32>
    %cst = arith.constant dense<0.000000e+00> : vector<16x50xf32>
    %2 = tpu.matmul %0, %1, %cst {dimension_numbers = #tpu.dot_dimension_numbers<[1], [0], [0], [1], [0, 0, 1, 1], [], []>} : vector<16x32xf32>, vector<32x50xf32>, vector<16x50xf32> -> vector<16x50xf32>
    %c0_3 = arith.constant 0 : index
    %c0_4 = arith.constant 0 : index
    %3 = vector.load %arg2[%c0_3, %c0_4] : memref<1x50xf32, #tpu.memory_space<vmem>>, vector<1x50xf32>
    %4 = vector.broadcast %3 : vector<1x50xf32> to vector<16x50xf32>
    %5 = arith.addf %2, %4 : vector<16x50xf32>
    %c0_5 = arith.constant 0 : index
    %c0_6 = arith.constant 0 : index
    %6 = vector.load %arg3[%c0_5, %c0_6] : memref<16x50xf32, #tpu.memory_space<vmem>>, vector<16x50xf32>
    tpu.vector_store %arg3[%c0_5, %c0_6], %5 {strides = array<i32>} : memref<16x50xf32, #tpu.memory_space<vmem>>, vector<16x50xf32>,
    return
  }
}

</mosaic_0001>

<bundles_post_ra>
// kernel: transformer_forward.21
= control target key start
LH: loop header
LB: loop body
LE: loop exit
PB: predicated region body
PF: predicated region fallthrough
CT: control target
= control target key end

     0   :  { %vm28_vm0 = vcmask 261120   ;;  %s221_s0 = inlined_call_operand.vmem [shape: f32[16,32], index: 0, kind: input, shape index: {}]   ;;  %s222_s1 = inlined_call_operand.vmem [shape: f32[32,50], index: 1, kind: input, shape index: {}]   ;;  %s223_s2 = inlined_call_operand.vmem [shape: f32[1,50], index: 2, kind: input, shape index: {}]   ;;  %s224_s3 = inlined_call_operand.hbm [shape: f32[16,50], index: 3, kind: output, shape index: {}]  }
   0x1   :  { %v20_v0 = vld [vmem:[%s222_s1 + $0x18] sm:$0xff]  ;;  %v19_v1 = vld [vmem:[%s222_s1 + $0x10] sm:$0xff]  ;;  %v15_v2 = vld [vmem:[%s221_s0] sm:$0xff] }
   0x2   :  { %138 = vmatprep.subr.mxu0 %v20_v0  ;;  %v18_v3 = vld [vmem:[%s222_s1 + $0x8] sm:$0xff]  ;;  %146 = vmatprep.mubr.msk.f32.mxu0 %vm28_vm0, %v15_v2 }
   0x3   :  { %139 = vmatpush3.msra.mxu0 %v20_v0 }
   0x4   :  { %8 = vsyncpa [#allocation3], 0  ;;  %140 = vmatprep.subr.mxu0 %v19_v1  ;;  %v17_v4 = vld [vmem:[%s222_s1] sm:$0xff]  ;;  %v16_v5 = vld [vmem:[%s221_s0 + $0x8] sm:$0xff]  ;;  %s174_s26 = smov [#allocation2]   ;;  %vm110_vm1 = vcmask 408576  }
   0x5   :  { %141 = vmatpush3.msra.mxu0 %v19_v1  ;;  %v129_v6 = vld [vmem:[%s223_s2] ss:$0 sm:$0xff]  ;;  %s118_s27 = sshll.u32 %s174_s26, 4  ;;  %s119_s27 = int_to_ptr.vmem [resolvable:$true] %s118_s27 }
   0x6   :  { %142 = vmatprep.subr.mxu0 %v18_v3  ;;  %s152_s1 = scalar_lea.vmem %s119_s27, 256  ;;  %p157_p1 = scmp.lt.s32.totalorder %s119_s27, %s119_s27 }
   0x7   :  { %143 = vmatpush3.msra.mxu0 %v18_v3  ;;  %p153_p0 = scmp.ne.s32.totalorder %s119_s27, %s152_s1  ;;  %p158_p2 = scmp.lt.s32.totalorder %s152_s1, %s152_s1 }
   0x8   :  { %144 = vmatprep.subr.mxu0 %v17_v4 }
   0x9   :  { %145 = vmatpush3.msra.mxu0 %v17_v4  ;;  %p159_p3 = por %p158_p2, %p157_p1 }
   0xa   :  { %147 = vmatmul.mubr.msk.f32.vlgmr.msra.gmra.mxu0 %vm28_vm0, %v16_v5 }
   0xb   :  { %p160_p4 = pnand %p159_p3, %p153_p0 }
  0xca   :  { %v148_v7 = vpop.f32.mrf.mxu0 }
  0xcb   :  { %v107_v8 = vadd.f32 %v148_v7, %v129_v6 }
  0xcc   :  { %v101_v9 = vpop.f32.mrf.mxu0 }
  0xcd   :  { %112 = vst.msk [vmem:[#allocation2 + $0x8] sm:$0xff] %vm110_vm1, %v107_v8  ;;  %v102_v10 = vadd.f32 %v129_v6, %v101_v9 }
  0xcf   :  { %111 = vst.msk [vmem:[#allocation2] sm:$0xff] %vm110_vm1, %v102_v10 }
  0xd0   :  { %163 = shalt.err (!%p160_p4)
}
  0xd1   :  { %s175_s0 = smov 128   ;;  %s176_s28 = smov 8  }
  0xd2   :  { %124 = dma.vmem_to_hbm [thread:$0]  %s119_s27, 256, %s224_s3, [#allocation3], %s175_s0, %s175_s0, %s176_s28  }
  0xd3   :  { %172 = dma.done.wait [#allocation3], 256  }
  0xd4   :  { %173 = vsyncadd [#allocation3], 4294967040 }
  0xd5   :  { %128 = vsyncpa [#allocation3], 1 }

// kernel: transformer_forward.12
= control target key start
LH: loop header
LB: loop body
LE: loop exit
PB: predicated region body
PF: predicated region fallthrough
CT: control target
= control target key end

     0   :  { %vm39_vm0 = vcmask 261120   ;;  %vm138_vm1 = vcmask 523264   ;;  %s439_s1 = inlined_call_operand.vmem [shape: f32[32,64], index: 1, kind: input, shape index: {}]   ;;  %s440_s0 = inlined_call_operand.vmem [shape: f32[16,32], index: 0, kind: input, shape index: {}]   ;;  %s441_s3 = inlined_call_operand.vmem [shape: f32[64,32], index: 3, kind: input, shape index: {}]   ;;  %s442_s2 = inlined_call_operand.vmem [shape: f32[1,64], index: 2, kind: input, shape index: {}]   ;;  %s443_s4 = inlined_call_operand.vmem [shape: f32[1,32], index: 4, kind: input, shape index: {}]   ;;  %s444_s5 = inlined_call_operand.vmem [shape: f32[1,32], index: 5, kind: input, shape index: {}]   ;;  %s445_s6 = inlined_call_operand.vmem [shape: f32[1,32], index: 6, kind: input, shape index: {}]   ;;  %s446_s7 = inlined_call_operand.vmem [shape: f32[16,32], index: 7, kind: output, shape index: {}]  }
   0x1   :  { %v31_v0 = vld [vmem:[%s439_s1 + $0x18] sm:$0xff]  ;;  %v30_v1 = vld [vmem:[%s439_s1 + $0x10] sm:$0xff]  ;;  %v26_v2 = vld [vmem:[%s440_s0] sm:$0xff] }
   0x2   :  { %297 = vmatprep.subr.mxu0 %v31_v0  ;;  %v29_v3 = vld [vmem:[%s439_s1 + $0x8] sm:$0xff]  ;;  %305 = vmatprep.mubr.msk.f32.mxu0 %vm39_vm0, %v26_v2  ;;  %v130_v4 = vld [vmem:[%s441_s3 + $0x38] sm:$0xff]  ;;  %v129_v5 = vld [vmem:[%s441_s3 + $0x30] sm:$0xff] }
   0x3   :  { %298 = vmatpush3.msra.mxu0 %v31_v0  ;;  %308 = vmatprep.subr.mxu1 %v130_v4  ;;  %v28_v6 = vld [vmem:[%s439_s1] sm:$0xff]  ;;  %v128_v7 = vld [vmem:[%s441_s3 + $0x28] sm:$0xff]  ;;  %v126_v10 = vld [vmem:[%s441_s3 + $0x18] sm:$0xff] }
   0x4   :  { %299 = vmatprep.subr.mxu0 %v30_v1  ;;  %309 = vmatpush3.msra.mxu1 %v130_v4  ;;  %v27_v8 = vld [vmem:[%s440_s0 + $0x8] sm:$0xff]  ;;  %v127_v9 = vld [vmem:[%s441_s3 + $0x20] sm:$0xff]  ;;  %v125_v11 = vld [vmem:[%s441_s3 + $0x10] sm:$0xff] }
   0x5   :  { %300 = vmatpush3.msra.mxu0 %v30_v1  ;;  %310 = vmatprep.subr.mxu1 %v129_v5  ;;  %v124_v12 = vld [vmem:[%s441_s3 + $0x8] sm:$0xff]  ;;  %v123_v13 = vld [vmem:[%s441_s3] sm:$0xff] }
   0x6   :  { %301 = vmatprep.subr.mxu0 %v29_v3  ;;  %311 = vmatpush3.msra.mxu1 %v129_v5  ;;  %v273_v14 = vld [vmem:[%s442_s2] ss:$0 sm:$0xff] }
   0x7   :  { %302 = vmatpush3.msra.mxu0 %v29_v3  ;;  %312 = vmatprep.subr.mxu1 %v128_v7  ;;  %v276_v22 = vld [vmem:[%s443_s4] ss:$0 sm:$0xff] }
   0x8   :  { %303 = vmatprep.subr.mxu0 %v28_v6  ;;  %313 = vmatpush3.msra.mxu1 %v128_v7  ;;  %v279_v47 = vld [vmem:[%s444_s5] ss:$0 sm:$0xff] }
   0x9   :  { %304 = vmatpush3.msra.mxu0 %v28_v6  ;;  %314 = vmatprep.subr.mxu1 %v127_v9  ;;  %v280_v49 = vld [vmem:[%s445_s6] ss:$0 sm:$0xff] }
   0xa   :  { %306 = vmatmul.mubr.msk.f32.vlgmr.msra.gmra.mxu0 %vm39_vm0, %v27_v8  ;;  %315 = vmatpush3.msra.mxu1 %v127_v9 }
   0xb   :  { %316 = vmatprep.subr.mxu1 %v126_v10 }
   0xc   :  { %317 = vmatpush3.msra.mxu1 %v126_v10 }
   0xd   :  { %318 = vmatprep.subr.mxu1 %v125_v11 }
   0xe   :  { %319 = vmatpush3.msra.mxu1 %v125_v11 }
   0xf   :  { %320 = vmatprep.subr.mxu1 %v124_v12 }
  0x10   :  { %321 = vmatpush3.msra.mxu1 %v124_v12 }
  0x11   :  { %322 = vmatprep.subr.mxu1 %v123_v13 }
  0x12   :  { %323 = vmatpush3.msra.mxu1 %v123_v13 }
  0xca   :  { %v307_v15 = vpop.f32.mrf.mxu0 }
  0xcb   :  { %v118_v16 = vadd.f32 %v307_v15, %v273_v14 }
  0xcc   :  { %v112_v17 = vpop.f32.mrf.mxu0 }
  0xcd   :  { %v113_v18 = vadd.f32 %v273_v14, %v112_v17  ;;  %v122_v20 = vmax.f32 %v118_v16, 0.0 }
  0xcf   :  { %v121_v19 = vmax.f32 %v113_v18, 0.0 }
  0xd1   :  { %324 = vmatprep.mubr.msk.f32.mxu1 %vm138_vm1, %v121_v19 }
  0xd2   :  { %325 = vmatmul.mubr.msk.f32.vlgmr.msra.gmra.mxu1 %vm138_vm1, %v122_v20 }
 0x192   :  { %v326_v21 = vpop.f32.mrf.mxu1 }
 0x193   :  { %v217_v24 = vadd.f32 %v326_v21, %v276_v22 }
 0x194   :  { %v211_v23 = vpop.f32.mrf.mxu1 }
 0x195   :  { %v212_v25 = vadd.f32 %v276_v22, %v211_v23  ;;  %v221_v28 = vadd.f32 %v217_v24, %v27_v8 }
 0x197   :  { %v220_v26 = vadd.f32 %v212_v25, %v26_v2  ;;  %v227_v29 = vsel %vm39_vm0, %v221_v28, 0.0 }
 0x199   :  { %v224_v27 = vsel %vm39_vm0, %v220_v26, 0.0 }
 0x19a   :  { %225 = vadd.xlane.f32.xlu0 %v224_v27 }
 0x19e   :  { %228 = vadd.xlane.f32.xlu0 %v227_v29 }
 0x223   :  { %v226_v30 = vpop.xlane.xlu0 %225 }
 0x224   :  { %v231_v31 = vmul.f32 0.03125, %v226_v30 }
 0x226   :  { %v233_v32 = vsub.f32 %v220_v26, %v231_v31 }
 0x227   :  { %v229_v33 = vpop.xlane.xlu0 %228 }
 0x228   :  { %v232_v34 = vmul.f32 0.03125, %v229_v33  ;;  %v235_v35 = vmul.f32 %v233_v32, %v233_v32 }
 0x22a   :  { %v234_v36 = vsub.f32 %v221_v28, %v232_v34  ;;  %v237_v37 = vsel %vm39_vm0, %v235_v35, 0.0 }
 0x22b   :  { %238 = vadd.xlane.f32.xlu1 %v237_v37 }
 0x22c   :  { %v236_v38 = vmul.f32 %v234_v36, %v234_v36 }
 0x22e   :  { %v240_v39 = vsel %vm39_vm0, %v236_v38, 0.0 }
 0x22f   :  { %241 = vadd.xlane.f32.xlu1 %v240_v39 }
 0x2b4   :  { %v239_v40 = vpop.xlane.xlu1 %238 }
 0x2b5   :  { %v243_v41 = vmul.f32 0.03125, %v239_v40 }
 0x2b7   :  { %v245_v42 = vadd.f32 1e-05, %v243_v41 }
 0x2b8   :  { %v242_v43 = vpop.xlane.xlu1 %241 }
 0x2b9   :  { %327 = vrsqrt.f32 %v245_v42  ;;  %v244_v44 = vmul.f32 0.03125, %v242_v43 }
 0x2bb   :  { %v246_v45 = vadd.f32 1e-05, %v244_v44 }
 0x2bd   :  { %329 = vrsqrt.f32 %v246_v45 }
 0x2c6   :  { %v328_v46 = vpop.eup %327 }
 0x2c7   :  { %v249_v48 = vmul.f32 %v328_v46, %v233_v32 }
 0x2c9   :  { %v257_v50 = vmul.f32 %v279_v47, %v249_v48 }
 0x2ca   :  { %v330_v51 = vpop.eup %329 }
 0x2cb   :  { %v265_v52 = vadd.f32 %v280_v49, %v257_v50  ;;  %v250_v53 = vmul.f32 %v330_v51, %v234_v36 }
 0x2cd   :  { %267 = vst.msk [vmem:[%s446_s7] sm:$0xff] %vm39_vm0, %v265_v52  ;;  %v258_v54 = vmul.f32 %v279_v47, %v250_v53 }
 0x2cf   :  { %v266_v55 = vadd.f32 %v280_v49, %v258_v54 }
 0x2d1   :  { %268 = vst.msk [vmem:[%s446_s7 + $0x8] sm:$0xff] %vm39_vm0, %v266_v55 }

// kernel: transformer_forward.16
= control target key start
LH: loop header
LB: loop body
LE: loop exit
PB: predicated region body
PF: predicated region fallthrough
CT: control target
= control target key end

     0   :  { %vm44_vm0 = vcmask 261120   ;;  %s795_s11 = smov 112   ;;  %v796_v7 = vmov 0.0   ;;  %vm797_vm1 = vmmov 0   ;;  %vm229_vm2 = vcmask 64512   ;;  %s928_s2 = inlined_call_operand.vmem [shape: f32[32,24], index: 2, kind: input, shape index: {}]   ;;  %s929_s0 = inlined_call_operand.vmem [shape: f32[16,32], index: 0, kind: input, shape index: {}]   ;;  %s930_s1 = inlined_call_operand.vmem [shape: f32[16,32], index: 1, kind: input, shape index: {}]   ;;  %s931_s3 = inlined_call_operand.vmem [shape: f32[1,24], index: 3, kind: input, shape index: {}]   ;;  %s932_s4 = inlined_call_operand.vmem [shape: f32[8,32], index: 4, kind: input, shape index: {}]   ;;  %s933_s5 = inlined_call_operand.vmem [shape: f32[1,32], index: 5, kind: input, shape index: {}]   ;;  %s934_s6 = inlined_call_operand.vmem [shape: f32[1,32], index: 6, kind: input, shape index: {}]   ;;  %s935_s7 = inlined_call_operand.vmem [shape: f32[1,32], index: 7, kind: input, shape index: {}]   ;;  %s936_s8 = inlined_call_operand.vmem [shape: f32[16,32], index: 8, kind: output, shape index: {}]  }
   0x1   :  { %v34_v0 = vld [vmem:[%s928_s2 + $0x18] sm:$0xff]  ;;  %v33_v1 = vld [vmem:[%s928_s2 + $0x10] sm:$0xff]  ;;  %v29_v2 = vld [vmem:[%s929_s0] sm:$0xff] }
   0x2   :  { %732 = vmatprep.subr.mxu0 %v34_v0  ;;  %136 = vrot.lane.b32.xlu0 %v34_v0, %s795_s11  ;;  %v32_v3 = vld [vmem:[%s928_s2 + $0x8] sm:$0xff]  ;;  %v31_v4 = vld [vmem:[%s928_s2] sm:$0xff] }
   0x3   :  { %733 = vmatpush3.msra.mxu0 %v34_v0  ;;  %740 = vmatprep.mubr.msk.f32.mxu0 %vm44_vm0, %v29_v2  ;;  %v30_v5 = vld [vmem:[%s929_s0 + $0x8] sm:$0xff]  ;;  %v871_v6 = vld [vmem:[%s930_s1] sm:$0xff] }
   0x4   :  { %734 = vmatprep.subr.mxu0 %v33_v1  ;;  %132 = vrot.lane.b32.xlu1 %v32_v3, %s795_s11  ;;  %v878_v12 = vld [vmem:[%s930_s1 + $0x8] sm:$0xff]  ;;  %v693_v13 = vld [vmem:[%s931_s3] ss:$0 sm:$0xff]  ;;  %s798_s1 = smov 120  }
   0x5   :  { %735 = vmatpush3.msra.mxu0 %v33_v1  ;;  %751 = vmatprep.mubr.msk.f32.mxu1 %vm44_vm0, %v871_v6  ;;  %v551_v49 = vld [vmem:[%s932_s4] sm:$0xff] }
   0x6   :  { %736 = vmatprep.subr.mxu0 %v32_v3  ;;  %134 = vrot.lane.b32.xlu0 %v33_v1, %s795_s11  ;;  %v704_v55 = vld [vmem:[%s933_s5] ss:$0 sm:$0xff] }
   0x7   :  { %737 = vmatpush3.msra.mxu0 %v32_v3 }
   0x8   :  { %738 = vmatprep.subr.mxu0 %v31_v4  ;;  %130 = vrot.lane.b32.xlu1 %v31_v4, %s795_s11 }
   0x9   :  { %739 = vmatpush3.msra.mxu0 %v31_v4 }
   0xa   :  { %741 = vmatmul.mubr.msk.f32.vlgmr.msra.gmra.mxu0 %vm44_vm0, %v30_v5  ;;  %754 = vmatprep.subr.mxu0 %v796_v7 }
   0xb   :  { %756 = vmatprep.mubr.msk.f32.mxu0 %vm797_vm1, %v796_v7 }
  0x74   :  { %v137_v8 = vpop.permute.xlu0 %136 }
  0x75   :  { %743 = vmatprep.subr.mxu1 %v137_v8 }
  0x76   :  { %v133_v9 = vpop.permute.xlu1 %132  ;;  %744 = vmatpush3.msra.mxu1 %v137_v8 }
  0x78   :  { %v135_v10 = vpop.permute.xlu0 %134 }
  0x79   :  { %745 = vmatprep.subr.mxu1 %v135_v10 }
  0x7a   :  { %746 = vmatpush3.msra.mxu1 %v135_v10  ;;  %v131_v11 = vpop.permute.xlu1 %130 }
  0x7b   :  { %747 = vmatprep.subr.mxu1 %v133_v9 }
  0x7c   :  { %748 = vmatpush3.msra.mxu1 %v133_v9 }
  0x7d   :  { %749 = vmatprep.subr.mxu1 %v131_v11 }
  0x7e   :  { %750 = vmatpush3.msra.mxu1 %v131_v11 }
  0x7f   :  { %752 = vmatmul.mubr.msk.f32.vlgmr.msra.gmra.mxu1 %vm44_vm0, %v878_v12  ;;  %759 = vmatprep.subr.mxu1 %v796_v7 }
  0x80   :  { %761 = vmatprep.mubr.msk.f32.mxu1 %vm797_vm1, %v796_v7 }
  0xca   :  { %v742_v14 = vpop.f32.mrf.mxu0 }
  0xcb   :  { %v123_v15 = vadd.f32 %v742_v14, %v693_v13 }
  0xcc   :  { %v117_v16 = vpop.f32.mrf.mxu0 }
  0xcd   :  { %v118_v17 = vadd.f32 %v693_v13, %v117_v16  ;;  %305 = vrot.lane.b32.xlu1 %v123_v15, %s798_s1  ;;  %v707_v16 = vld [vmem:[%s934_s6] ss:$0 sm:$0xff] }
  0xcf   :  { %227 = vrot.lane.b32.xlu0 %v118_v17, %s798_s1 }
 0x13f   :  { %v306_v18 = vpop.permute.xlu1 %305  ;;  %v753_v20 = vpop.f32.mrf.mxu1 }
 0x140   :  { %760 = vmatpush3.xpose.msk.msra.mxu1 %vm229_vm2, %v306_v18  ;;  %v708_v18 = vld [vmem:[%s935_s7] ss:$0 sm:$0xff] }
 0x141   :  { %v228_v19 = vpop.permute.xlu0 %227  ;;  %769 = vmatprep.subr.mxu1 %v796_v7  ;;  %v217_v21 = vpop.f32.mrf.mxu1 }
 0x142   :  { %755 = vmatpush3.xpose.msk.msra.mxu0 %vm229_vm2, %v228_v19 }
 0x143   :  { %762 = vmatmul.mubr.msk.f32.vlgmr.msra.gmra.mxu1 %vm229_vm2, %v123_v15  ;;  %764 = vmatprep.subr.mxu0 %v796_v7 }
 0x144   :  { %771 = vmatprep.mubr.msk.f32.mxu1 %vm797_vm1, %v796_v7 }
 0x145   :  { %757 = vmatmul.mubr.msk.f32.vlgmr.msra.gmra.mxu0 %vm229_vm2, %v118_v17 }
 0x146   :  { %766 = vmatprep.mubr.msk.f32.mxu0 %vm797_vm1, %v796_v7 }
 0x203   :  { %v377_v22 = vpop.f32.mrf.mxu1 }
 0x204   :  { %v382_v23 = vmul.f32 0.35355338, %v377_v22 }
 0x205   :  { %v300_v24 = vpop.f32.mrf.mxu0  ;;  %v763_v25 = vpop.f32.mrf.mxu1 }
 0x206   :  { %v381_v26 = vmul.f32 0.35355338, %v300_v24  ;;  %v386_v27 = vsel %vm229_vm2, %v382_v23, -inf }
 0x207   :  { %387 = vmax.xlane.f32.xlu1 %v386_v27  ;;  %v758_v28 = vpop.f32.mrf.mxu0 }
 0x208   :  { %v383_v29 = vsel %vm229_vm2, %v381_v26, -inf }
 0x209   :  { %384 = vmax.xlane.f32.xlu0 %v383_v29 }
 0x218   :  { %142 = vrot.lane.b32.xlu1 %v693_v13, %s795_s11 }
 0x290   :  { %v388_v30 = vpop.xlane.xlu1 %387 }
 0x291   :  { %v390_v31 = vsub.f32 %v382_v23, %v388_v30 }
 0x292   :  { %v385_v32 = vpop.xlane.xlu0 %384 }
 0x293   :  { %v389_v33 = vsub.f32 %v381_v26, %v385_v32  ;;  %v393_v35 = vmul.f32 1.442695, %v390_v31 }
 0x294   :  { %v143_v34 = vpop.permute.xlu1 %142 }
 0x295   :  { %v391_v36 = vmul.f32 1.442695, %v389_v33  ;;  %v218_v37 = vadd.f32 %v217_v21, %v143_v34  ;;  %v223_v38 = vadd.f32 %v753_v20, %v143_v34 }
 0x297   :  { %783 = vpow2.f32 %v391_v36  ;;  %765 = vmatpush3.msra.mxu0 %v218_v37  ;;  %770 = vmatpush3.msra.mxu1 %v223_v38 }
 0x298   :  { %785 = vpow2.f32 %v393_v35  ;;  %774 = vmatprep.subr.mxu0 %v551_v49 }
 0x2a4   :  { %v784_v39 = vpop.eup %783 }
 0x2a5   :  { %v395_v40 = vsel %vm229_vm2, %v784_v39, 0.0  ;;  %v786_v41 = vpop.eup %785 }
 0x2a6   :  { %396 = vadd.xlane.f32.xlu0 %v395_v40  ;;  %v398_v42 = vsel %vm229_vm2, %v786_v41, 0.0 }
 0x2aa   :  { %399 = vadd.xlane.f32.xlu0 %v398_v42 }
 0x32f   :  { %v397_v43 = vpop.xlane.xlu0 %396 }
 0x330   :  { %787 = vrcp.f32 %v397_v43 }
 0x333   :  { %v400_v44 = vpop.xlane.xlu0 %399 }
 0x334   :  { %789 = vrcp.f32 %v400_v44 }
 0x33d   :  { %v788_v45 = vpop.eup %787 }
 0x33e   :  { %v403_v46 = vmul.f32 %v788_v45, %v784_v39 }
 0x340   :  { %767 = vmatmul.mubr.msk.f32.vlgmr.msra.gmra.mxu0 %vm229_vm2, %v403_v46 }
 0x341   :  { %v790_v47 = vpop.eup %789  ;;  %775 = vmatpush3.msra.mxu0 %v551_v49 }
 0x342   :  { %v404_v48 = vmul.f32 %v790_v47, %v786_v41 }
 0x344   :  { %772 = vmatmul.mubr.msk.f32.vlgmr.msra.gmra.mxu1 %vm229_vm2, %v404_v48 }
 0x400   :  { %v474_v50 = vpop.f32.mrf.mxu0 }
 0x401   :  { %776 = vmatprep.mubr.msk.f32.mxu0 %vm229_vm2, %v474_v50 }
 0x402   :  { %v768_v51 = vpop.f32.mrf.mxu0 }
 0x404   :  { %v547_v52 = vpop.f32.mrf.mxu1 }
 0x405   :  { %777 = vmatmul.mubr.msk.f32.vlgmr.msra.gmra.mxu0 %vm229_vm2, %v547_v52 }
 0x406   :  { %v773_v53 = vpop.f32.mrf.mxu1 }
 0x4c5   :  { %v778_v54 = vpop.f32.mrf.mxu0 }
 0x4c6   :  { %v637_v57 = vadd.f32 %v778_v54, %v704_v55 }
 0x4c7   :  { %v631_v56 = vpop.f32.mrf.mxu0 }
 0x4c8   :  { %v632_v58 = vadd.f32 %v704_v55, %v631_v56  ;;  %v641_v61 = vadd.f32 %v637_v57, %v878_v12 }
 0x4ca   :  { %v640_v59 = vadd.f32 %v632_v58, %v871_v6  ;;  %v647_v62 = vsel %vm44_vm0, %v641_v61, 0.0 }
 0x4cc   :  { %v644_v60 = vsel %vm44_vm0, %v640_v59, 0.0 }
 0x4cd   :  { %645 = vadd.xlane.f32.xlu0 %v644_v60 }
 0x4d1   :  { %648 = vadd.xlane.f32.xlu0 %v647_v62 }
 0x556   :  { %v646_v63 = vpop.xlane.xlu0 %645 }
 0x557   :  { %v651_v0 = vmul.f32 0.03125, %v646_v63 }
 0x559   :  { %v653_v1 = vsub.f32 %v640_v59, %v651_v0 }
 0x55a   :  { %v649_v2 = vpop.xlane.xlu0 %648 }
 0x55b   :  { %v652_v3 = vmul.f32 0.03125, %v649_v2  ;;  %v655_v4 = vmul.f32 %v653_v1, %v653_v1 }
 0x55d   :  { %v654_v5 = vsub.f32 %v641_v61, %v652_v3  ;;  %v657_v7 = vsel %vm44_vm0, %v655_v4, 0.0 }
 0x55e   :  { %658 = vadd.xlane.f32.xlu0 %v657_v7 }
 0x55f   :  { %v656_v8 = vmul.f32 %v654_v5, %v654_v5 }
 0x561   :  { %v660_v6 = vsel %vm44_vm0, %v656_v8, 0.0 }
 0x562   :  { %661 = vadd.xlane.f32.xlu0 %v660_v6 }
 0x5e7   :  { %v659_v9 = vpop.xlane.xlu0 %658 }
 0x5e8   :  { %v663_v10 = vmul.f32 0.03125, %v659_v9 }
 0x5ea   :  { %v665_v11 = vadd.f32 1e-05, %v663_v10 }
 0x5eb   :  { %v662_v12 = vpop.xlane.xlu0 %661 }
 0x5ec   :  { %791 = vrsqrt.f32 %v665_v11  ;;  %v664_v13 = vmul.f32 0.03125, %v662_v12 }
 0x5ee   :  { %v666_v14 = vadd.f32 1e-05, %v664_v13 }
 0x5f0   :  { %793 = vrsqrt.f32 %v666_v14 }
 0x5f9   :  { %v792_v15 = vpop.eup %791 }
 0x5fa   :  { %v669_v17 = vmul.f32 %v792_v15, %v653_v1 }
 0x5fc   :  { %v677_v19 = vmul.f32 %v707_v16, %v669_v17 }
 0x5fd   :  { %v794_v20 = vpop.eup %793 }
 0x5fe   :  { %v685_v21 = vadd.f32 %v708_v18, %v677_v19  ;;  %v670_v22 = vmul.f32 %v794_v20, %v654_v5 }
 0x600   :  { %687 = vst.msk [vmem:[%s936_s8] sm:$0xff] %vm44_vm0, %v685_v21  ;;  %v678_v23 = vmul.f32 %v707_v16, %v670_v22 }
 0x602   :  { %v686_v24 = vadd.f32 %v708_v18, %v678_v23 }
 0x604   :  { %688 = vst.msk [vmem:[%s936_s8 + $0x8] sm:$0xff] %vm44_vm0, %v686_v24 }

// kernel: transformer_forward.11
= control target key start
LH: loop header
LB: loop body
LE: loop exit
PB: predicated region body
PF: predicated region fallthrough
CT: control target
= control target key end

     0   :  { %vm42_vm0 = vcmask 261120   ;;  %v680_v6 = vmov 0.0   ;;  %vm681_vm1 = vmmov 0   ;;  %vm127_vm2 = vcmask 64512   ;;  %s800_s1 = inlined_call_operand.vmem [shape: f32[16,32], index: 1, kind: input, shape index: {}, may-alias: {0,1}]   ;;  %s801_s2 = inlined_call_operand.vmem [shape: f32[32,24], index: 2, kind: input, shape index: {}]   ;;  %s802_s0 = inlined_call_operand.vmem [shape: f32[16,32], index: 0, kind: input, shape index: {}, may-alias: {0,1}]   ;;  %s803_s3 = inlined_call_operand.vmem [shape: f32[1,24], index: 3, kind: input, shape index: {}]   ;;  %s804_s4 = inlined_call_operand.vmem [shape: f32[8,32], index: 4, kind: input, shape index: {}]   ;;  %s805_s5 = inlined_call_operand.vmem [shape: f32[1,32], index: 5, kind: input, shape index: {}]   ;;  %s806_s6 = inlined_call_operand.vmem [shape: f32[1,32], index: 6, kind: input, shape index: {}]   ;;  %s807_s7 = inlined_call_operand.vmem [shape: f32[1,32], index: 7, kind: input, shape index: {}]   ;;  %s808_s8 = inlined_call_operand.vmem [shape: f32[16,32], index: 8, kind: output, shape index: {}]  }
   0x1   :  { %v34_v0 = vld [vmem:[%s801_s2 + $0x18] sm:$0xff]  ;;  %v33_v1 = vld [vmem:[%s801_s2 + $0x10] sm:$0xff]  ;;  %v738_v2 = vld [vmem:[%s802_s0] sm:$0xff]  ;;  %639 = vmatprep.subr.mxu1 %v680_v6  ;;  %641 = vmatprep.mubr.msk.f32.mxu1 %vm681_vm1, %v680_v6 }
   0x2   :  { %628 = vmatprep.subr.mxu0 %v34_v0  ;;  %v32_v3 = vld [vmem:[%s801_s2 + $0x8] sm:$0xff]  ;;  %636 = vmatprep.mubr.msk.f32.mxu0 %vm42_vm0, %v738_v2  ;;  %v31_v4 = vld [vmem:[%s801_s2] sm:$0xff] }
   0x3   :  { %629 = vmatpush3.msra.mxu0 %v34_v0  ;;  %v751_v5 = vld [vmem:[%s802_s0 + $0x8] sm:$0xff]  ;;  %v597_v8 = vld [vmem:[%s803_s3] ss:$0 sm:$0xff]  ;;  %s682_s0 = smov 120   ;;  %s683_s3 = smov 112  }
   0x4   :  { %630 = vmatprep.subr.mxu0 %v33_v1  ;;  %v455_v40 = vld [vmem:[%s804_s4] sm:$0xff] }
   0x5   :  { %631 = vmatpush3.msra.mxu0 %v33_v1  ;;  %v606_v45 = vld [vmem:[%s805_s5] ss:$0 sm:$0xff] }
   0x6   :  { %632 = vmatprep.subr.mxu0 %v32_v3 }
   0x7   :  { %633 = vmatpush3.msra.mxu0 %v32_v3 }
   0x8   :  { %634 = vmatprep.subr.mxu0 %v31_v4 }
   0x9   :  { %635 = vmatpush3.msra.mxu0 %v31_v4 }
   0xa   :  { %637 = vmatmul.mubr.msk.f32.vlgmr.msra.gmra.mxu0 %vm42_vm0, %v751_v5  ;;  %649 = vmatprep.subr.mxu0 %v680_v6 }
   0xb   :  { %651 = vmatprep.mubr.msk.f32.mxu0 %vm681_vm1, %v680_v6 }
  0xca   :  { %v638_v7 = vpop.f32.mrf.mxu0 }
  0xcb   :  { %v121_v11 = vadd.f32 %v638_v7, %v597_v8  ;;  %v609_v7 = vld [vmem:[%s806_s6] ss:$0 sm:$0xff] }
  0xcc   :  { %v115_v9 = vpop.f32.mrf.mxu0 }
  0xcd   :  { %v116_v10 = vadd.f32 %v597_v8, %v115_v9  ;;  %v610_v9 = vld [vmem:[%s807_s7] ss:$0 sm:$0xff] }
  0xcf   :  { %125 = vrot.lane.b32.xlu0 %v116_v10, %s682_s0 }
  0xd3   :  { %203 = vrot.lane.b32.xlu0 %v121_v11, %s682_s0 }
 0x141   :  { %v126_v12 = vpop.permute.xlu0 %125 }
 0x142   :  { %640 = vmatpush3.xpose.msk.msra.mxu1 %vm127_vm2, %v126_v12 }
 0x143   :  { %644 = vmatprep.subr.mxu1 %v680_v6 }
 0x145   :  { %642 = vmatmul.mubr.msk.f32.vlgmr.msra.gmra.mxu1 %vm127_vm2, %v116_v10  ;;  %v204_v13 = vpop.permute.xlu0 %203 }
 0x146   :  { %645 = vmatpush3.xpose.msk.msra.mxu1 %vm127_vm2, %v204_v13  ;;  %646 = vmatprep.mubr.msk.f32.mxu1 %vm681_vm1, %v680_v6 }
 0x147   :  { %654 = vmatprep.subr.mxu1 %v680_v6 }
 0x149   :  { %647 = vmatmul.mubr.msk.f32.vlgmr.msra.gmra.mxu1 %vm127_vm2, %v121_v11 }
 0x14a   :  { %656 = vmatprep.mubr.msk.f32.mxu1 %vm681_vm1, %v680_v6 }
 0x205   :  { %v198_v14 = vpop.f32.mrf.mxu1 }
 0x206   :  { %v279_v15 = vmul.f32 0.35355338, %v198_v14 }
 0x207   :  { %v643_v16 = vpop.f32.mrf.mxu1 }
 0x208   :  { %v281_v17 = vsel %vm127_vm2, %v279_v15, -inf }
 0x209   :  { %282 = vmax.xlane.f32.xlu1 %v281_v17  ;;  %v275_v18 = vpop.f32.mrf.mxu1 }
 0x20a   :  { %v280_v19 = vmul.f32 0.35355338, %v275_v18 }
 0x20b   :  { %v648_v20 = vpop.f32.mrf.mxu1 }
 0x20c   :  { %v284_v21 = vsel %vm127_vm2, %v280_v19, -inf }
 0x20d   :  { %285 = vmax.xlane.f32.xlu1 %v284_v21 }
 0x21e   :  { %303 = vrot.lane.b32.xlu1 %v116_v10, %s683_s3 }
 0x292   :  { %v283_v22 = vpop.xlane.xlu1 %282 }
 0x293   :  { %v287_v23 = vsub.f32 %v279_v15, %v283_v22 }
 0x295   :  { %v289_v24 = vmul.f32 1.442695, %v287_v23 }
 0x296   :  { %v286_v25 = vpop.xlane.xlu1 %285 }
 0x297   :  { %668 = vpow2.f32 %v289_v24  ;;  %v288_v26 = vsub.f32 %v280_v19, %v286_v25 }
 0x299   :  { %v291_v27 = vmul.f32 1.442695, %v288_v26 }
 0x29a   :  { %v304_v28 = vpop.permute.xlu1 %303 }
 0x29b   :  { %670 = vpow2.f32 %v291_v27  ;;  %650 = vmatpush3.msra.mxu0 %v304_v28 }
 0x29c   :  { %659 = vmatprep.subr.mxu0 %v455_v40 }
 0x2a4   :  { %v669_v29 = vpop.eup %668 }
 0x2a5   :  { %v293_v30 = vsel %vm127_vm2, %v669_v29, 0.0 }
 0x2a6   :  { %294 = vadd.xlane.f32.xlu0 %v293_v30 }
 0x2a8   :  { %v671_v31 = vpop.eup %670 }
 0x2a9   :  { %v296_v32 = vsel %vm127_vm2, %v671_v31, 0.0 }
 0x2aa   :  { %297 = vadd.xlane.f32.xlu1 %v296_v32 }
 0x2bb   :  { %379 = vrot.lane.b32.xlu1 %v121_v11, %s683_s3 }
 0x32f   :  { %v295_v33 = vpop.xlane.xlu0 %294 }
 0x330   :  { %672 = vrcp.f32 %v295_v33 }
 0x333   :  { %v298_v34 = vpop.xlane.xlu1 %297 }
 0x334   :  { %674 = vrcp.f32 %v298_v34 }
 0x337   :  { %v380_v35 = vpop.permute.xlu1 %379 }
 0x338   :  { %655 = vmatpush3.msra.mxu1 %v380_v35 }
 0x33d   :  { %v673_v36 = vpop.eup %672 }
 0x33e   :  { %v301_v37 = vmul.f32 %v673_v36, %v669_v29 }
 0x340   :  { %652 = vmatmul.mubr.msk.f32.vlgmr.msra.gmra.mxu0 %vm127_vm2, %v301_v37 }
 0x341   :  { %v675_v38 = vpop.eup %674  ;;  %660 = vmatpush3.msra.mxu0 %v455_v40 }
 0x342   :  { %v302_v39 = vmul.f32 %v675_v38, %v671_v31 }
 0x344   :  { %657 = vmatmul.mubr.msk.f32.vlgmr.msra.gmra.mxu1 %vm127_vm2, %v302_v39 }
 0x400   :  { %v375_v41 = vpop.f32.mrf.mxu0 }
 0x401   :  { %661 = vmatprep.mubr.msk.f32.mxu0 %vm127_vm2, %v375_v41 }
 0x402   :  { %v653_v42 = vpop.f32.mrf.mxu0 }
 0x404   :  { %v451_v43 = vpop.f32.mrf.mxu1 }
 0x405   :  { %662 = vmatmul.mubr.msk.f32.vlgmr.msra.gmra.mxu0 %vm127_vm2, %v451_v43 }
 0x406   :  { %v658_v44 = vpop.f32.mrf.mxu1 }
 0x4c5   :  { %v663_v46 = vpop.f32.mrf.mxu0 }
 0x4c6   :  { %v541_v47 = vadd.f32 %v663_v46, %v606_v45 }
 0x4c7   :  { %v535_v48 = vpop.f32.mrf.mxu0 }
 0x4c8   :  { %v536_v49 = vadd.f32 %v606_v45, %v535_v48  ;;  %v545_v50 = vadd.f32 %v541_v47, %v751_v5 }
 0x4ca   :  { %v551_v51 = vsel %vm42_vm0, %v545_v50, 0.0  ;;  %v544_v52 = vadd.f32 %v536_v49, %v738_v2 }
 0x4cb   :  { %552 = vadd.xlane.f32.xlu0 %v551_v51 }
 0x4cc   :  { %v548_v53 = vsel %vm42_vm0, %v544_v52, 0.0 }
 0x4cd   :  { %549 = vadd.xlane.f32.xlu1 %v548_v53 }
 0x554   :  { %v553_v54 = vpop.xlane.xlu0 %552 }
 0x555   :  { %v556_v55 = vmul.f32 0.03125, %v553_v54 }
 0x556   :  { %v550_v56 = vpop.xlane.xlu1 %549 }
 0x557   :  { %v555_v57 = vmul.f32 0.03125, %v550_v56  ;;  %v558_v58 = vsub.f32 %v545_v50, %v556_v55 }
 0x559   :  { %v557_v59 = vsub.f32 %v544_v52, %v555_v57  ;;  %v560_v62 = vmul.f32 %v558_v58, %v558_v58 }
 0x55b   :  { %v559_v60 = vmul.f32 %v557_v59, %v557_v59  ;;  %v564_v63 = vsel %vm42_vm0, %v560_v62, 0.0 }
 0x55d   :  { %v561_v61 = vsel %vm42_vm0, %v559_v60, 0.0 }
 0x55e   :  { %562 = vadd.xlane.f32.xlu0 %v561_v61 }
 0x562   :  { %565 = vadd.xlane.f32.xlu0 %v564_v63 }
 0x5e7   :  { %v563_v0 = vpop.xlane.xlu0 %562 }
 0x5e8   :  { %v567_v1 = vmul.f32 0.03125, %v563_v0 }
 0x5ea   :  { %v569_v2 = vadd.f32 1e-05, %v567_v1 }
 0x5eb   :  { %v566_v3 = vpop.xlane.xlu0 %565 }
 0x5ec   :  { %676 = vrsqrt.f32 %v569_v2  ;;  %v568_v4 = vmul.f32 0.03125, %v566_v3 }
 0x5ee   :  { %v570_v5 = vadd.f32 1e-05, %v568_v4 }
 0x5f0   :  { %678 = vrsqrt.f32 %v570_v5 }
 0x5f9   :  { %v677_v6 = vpop.eup %676 }
 0x5fa   :  { %v573_v8 = vmul.f32 %v677_v6, %v557_v59 }
 0x5fc   :  { %v581_v10 = vmul.f32 %v609_v7, %v573_v8 }
 0x5fd   :  { %v679_v11 = vpop.eup %678 }
 0x5fe   :  { %v589_v12 = vadd.f32 %v610_v9, %v581_v10  ;;  %v574_v13 = vmul.f32 %v679_v11, %v558_v58 }
 0x600   :  { %591 = vst.msk [vmem:[%s808_s8] sm:$0xff] %vm42_vm0, %v589_v12  ;;  %v582_v14 = vmul.f32 %v609_v7, %v574_v13 }
 0x602   :  { %v590_v15 = vadd.f32 %v610_v9, %v582_v14 }
 0x604   :  { %592 = vst.msk [vmem:[%s808_s8 + $0x8] sm:$0xff] %vm42_vm0, %v590_v15 }

</bundles_post_ra>
